<compile_context>
chip_gen: v5e
topology: v5e:2x2
jax: 0.10.0
libtpu: 0.0.40
codegen_flags: <defaults>
</compile_context>

<pallas_src>
import functools
import math

import numpy as np
import jax
import jax.numpy as jnp
from jax.experimental import pallas as pl
from jax.experimental.pallas import tpu as pltpu


# ----------------------------------------------------------------------------- kernel
def _eqsonn_kernel(xf_ref, pw_ref, g_ref, w1_ref, b1_ref, w2_ref, b2_ref, out_ref,
                   *, M, hf, hdim, nm, coef):
    xf = xf_ref[...]                        # [TB, 2*nm*M] f32  = [Re(x^T) | Im(x^T)] (mode-major)
    pw = pw_ref[...]                        # [TB, 1]      f32  per-sample power P

    # ---- triplet gather on the MXU: one static one-hot matmul -> Em*scale | En | Ek
    gath = jnp.dot(xf, g_ref[...], preferred_element_type=jnp.float32)   # [TB, 6*nm*hf]
    H = nm * hf
    em = gath[:, 0 * H:2 * H]               # [Re m0 | Re m1 | Im m0 | Im m1] * scale
    en = gath[:, 2 * H:4 * H]
    ek = gath[:, 4 * H:6 * H]

    # ---- TripletFeatures: s = sum_pol En*conj(Ek);  fo = s * (Em*scale)   (Nmodes == 2)
    en_re, en_im = en[:, :H], en[:, H:]
    ek_re, ek_im = ek[:, :H], ek[:, H:]
    a_re = en_re * ek_re + en_im * ek_im    # Re(En conj(Ek)) per mode
    a_im = en_im * ek_re - en_re * ek_im
    s_re = a_re[:, :hf] + a_re[:, hf:]      # cross-polarisation sum  [TB, hf]
    s_im = a_im[:, :hf] + a_im[:, hf:]
    s_re2 = jnp.concatenate([s_re, s_re], axis=-1)
    s_im2 = jnp.concatenate([s_im, s_im], axis=-1)
    em_re, em_im = em[:, :H], em[:, H:]
    fo_re = s_re2 * em_re - s_im2 * em_im
    fo_im = s_re2 * em_im + s_im2 * em_re
    fo_flat = jnp.concatenate([fo_re, fo_im], axis=-1)                    # [TB, 2*H]

    # ---- fused complex matmuls (bf16 operands, f32 accumulation)
    #      a_out = [a1_r | a1_i | a2_r | a2_i | corr_r0 corr_r1 corr_i0 corr_i1]
    #      b_out = [b1_r | b1_i | b2_r | b2_i]
    a_out = jnp.dot(fo_flat.astype(jnp.bfloat16), w1_ref[...],
                    preferred_element_type=jnp.float32) + b1_ref[...]     # [TB, 4*hdim + 2*nm]
    b_out = jnp.dot(xf.astype(jnp.bfloat16), w2_ref[...],
                    preferred_element_type=jnp.float32) + b2_ref[...]     # [TB, 4*hdim]

    # ---- second-order term:  sum_o (A B conj(B) + conj(A) B B) = sum_o 2*Re(A conj(B)) * B
    h = hdim
    ab = a_out[:, :4 * h] * b_out
    u1 = ab[:, 0 * h:1 * h] + ab[:, 1 * h:2 * h]     # Re(a1 conj(b1)) per hidden channel
    u2 = ab[:, 2 * h:3 * h] + ab[:, 3 * h:4 * h]     # Re(a2 conj(b2))
    b1r, b1i = b_out[:, 0 * h:1 * h], b_out[:, 1 * h:2 * h]
    b2r, b2i = b_out[:, 2 * h:3 * h], b_out[:, 3 * h:4 * h]
    t = jnp.concatenate([
        jnp.sum(u1 * b1r, axis=-1, keepdims=True),
        jnp.sum(u2 * b2r, axis=-1, keepdims=True),
        jnp.sum(u1 * b1i, axis=-1, keepdims=True),
        jnp.sum(u2 * b2i, axis=-1, keepdims=True)], axis=-1) * 2.0        # [TB, 2*nm]

    # ---- center tap x[:, M//2, :] taken exactly from the resident f32 tile
    p = M // 2
    xc = jnp.concatenate(
        [xf[:, c * M + p: c * M + p + 1] for c in range(nm)]
        + [xf[:, nm * M + c * M + p: nm * M + c * M + p + 1] for c in range(nm)],
        axis=-1)                                                          # [TB, 2*nm]

    corr = a_out[:, 4 * h:]                                               # PBC coefficient sums
    out_ref[...] = xc + pw * corr + coef * (pw * pw) * t                  # [TB, 2*nm] lane-dense


# ----------------------------------------------------------------------------- weight packing
def _pack_weights(params, M, Nm):
    hdim, hf = int(params["hdim"]), int(params["hf"])
    m_idx = np.asarray(params["m_idx"])
    n_idx = np.asarray(params["n_idx"])
    scale = np.asarray(params["scale"], np.float32)
    p = M // 2
    H = Nm * hf

    # gather matrix: x_flat[., 2*Nm*M] -> [Em*scale | En | Ek], each 2*Nm*hf (re-major, mode-major)
    G = np.zeros((2 * Nm * M, 6 * H), np.float32)
    cols = np.arange(hf)
    for part in range(2):
        for c in range(Nm):
            rb = part * Nm * M + c * M
            cb = part * H + c * hf
            G[rb + p + m_idx, 0 * H + cb + cols] = scale       # Em * symmetrisation scale
            G[rb + p + n_idx, 2 * H + cb + cols] = 1.0         # En
            G[rb + p + m_idx + n_idx, 4 * H + cb + cols] = 1.0  # Ek

    def cblock(Wc):   # [hdim, Nm, K] complex -> real block [2*Nm*K, 2*hdim]: [[Wr,Wi],[-Wi,Wr]]
        Wr = np.real(Wc).reshape(hdim, -1).T.astype(np.float32)
        Wi = np.imag(Wc).reshape(hdim, -1).T.astype(np.float32)
        return np.block([[Wr, Wi], [-Wi, Wr]])

    W1c = np.asarray(params["W1"]); W2c = np.asarray(params["W2"])
    b1c = np.asarray(params["b1"]); b2c = np.asarray(params["b2"])
    Cc = np.asarray(params["C"])

    # EqAMPBC coefficient reduction as extra output columns of the f1 matmul:
    # columns = [corr_r0, corr_r1, corr_i0, corr_i1]
    corr_cols = np.zeros((2 * H, 2 * Nm), np.float32)
    Cr, Ci = np.real(Cc).astype(np.float32), np.imag(Cc).astype(np.float32)
    for c in range(Nm):
        re_rows = slice(c * hf, (c + 1) * hf)
        im_rows = slice(H + c * hf, H + (c + 1) * hf)
        corr_cols[re_rows, c] = Cr[c];       corr_cols[im_rows, c] = -Ci[c]
        corr_cols[re_rows, Nm + c] = Ci[c];  corr_cols[im_rows, Nm + c] = Cr[c]

    W1big = np.concatenate([cblock(W1c), cblock(W1c[:, ::-1, :]), corr_cols], axis=1)
    W2big = np.concatenate([cblock(W2c), cblock(W2c[:, ::-1, :])], axis=1)
    b1big = np.concatenate([np.real(b1c), np.imag(b1c), np.real(b1c), np.imag(b1c),
                            np.zeros(2 * Nm)]).astype(np.float32)[None, :]
    b2big = np.concatenate([np.real(b2c), np.imag(b2c), np.real(b2c), np.imag(b2c)]
                           ).astype(np.float32)[None, :]

    return (jnp.asarray(G),
            jnp.asarray(W1big, dtype=jnp.bfloat16), jnp.asarray(b1big),
            jnp.asarray(W2big, dtype=jnp.bfloat16), jnp.asarray(b2big))


# ----------------------------------------------------------------------------- wrapper
def eqsonn_pallas(x, task_info, params, *, tb=None):
    """x: [B, M, Nmodes] complex64, task_info: [B, 4] float32 -> [B, Nmodes] complex64."""
    B, M, Nm = x.shape
    assert Nm == 2, "EqSoNN cross-polarisation / flip semantics assume Nmodes == 2"
    hdim, hf = int(params["hdim"]), int(params["hf"])

    G, W1, b1, W2, b2 = _pack_weights(params, M, Nm)

    # activation layout: [B, 2*Nm*M] = [Re(x^T) flat | Im(x^T) flat]  (exactly the f2 input)
    xt = jnp.transpose(x, (0, 2, 1)).reshape(B, Nm * M)
    xf = jnp.concatenate([jnp.real(xt), jnp.imag(xt)], axis=-1).astype(jnp.float32)

    # get_power (pkufiber): P = 10**(P_dBm / 10) / Nmodes
    P = (10.0 ** (task_info[:, 0] / 10.0) / Nm).astype(jnp.float32)[:, None]   # [B, 1]

    # batch tiling (TB multiple of 8; weights stay resident across all tiles)
    if tb is None:
        tb = max(8, min(256, ((B + 7) // 8) * 8))
    Bp = ((B + tb - 1) // tb) * tb
    if Bp != B:
        xf = jnp.pad(xf, ((0, Bp - B), (0, 0)))
        P = jnp.pad(P, ((0, Bp - B), (0, 0)))

    coef = 1e-4 / math.sqrt(hdim)
    kernel = functools.partial(_eqsonn_kernel, M=M, hf=hf, hdim=hdim, nm=Nm, coef=coef)

    def tiled(shape):
        nd = len(shape)
        return pl.BlockSpec((tb,) + tuple(shape[1:]), lambda i, nd=nd: (i,) + (0,) * (nd - 1))

    def resident(shape):
        nd = len(shape)
        return pl.BlockSpec(tuple(shape), lambda i, nd=nd: (0,) * nd)

    flops = int(2 * Bp * (G.shape[0] * G.shape[1] + W1.shape[0] * W1.shape[1]
                          + W2.shape[0] * W2.shape[1]) + Bp * 40 * hf)
    bytes_accessed = int((xf.size + P.size + Bp * 2 * Nm + G.size + b1.size + b2.size) * 4
                         + (W1.size + W2.size) * 2)

    out = pl.pallas_call(
        kernel,
        grid=(Bp // tb,),
        in_specs=[tiled(xf.shape), tiled(P.shape),
                  resident(G.shape), resident(W1.shape), resident(b1.shape),
                  resident(W2.shape), resident(b2.shape)],
        out_specs=tiled((Bp, 2 * Nm)),
        out_shape=jax.ShapeDtypeStruct((Bp, 2 * Nm), jnp.float32),
        compiler_params=pltpu.CompilerParams(dimension_semantics=("parallel",)),
        cost_estimate=pl.CostEstimate(flops=flops, transcendentals=0,
                                      bytes_accessed=bytes_accessed),
    )(xf, P, G, W1, b1, W2, b2)

    out = out[:B]
    return (out[:, :Nm] + 1j * out[:, Nm:]).astype(jnp.complex64)


# ----------------------------------------------------------------------------- triplets / params
def triplet_index(M, rho):
    L = M // 2
    S = []
    for m in range(-L, L + 1):
        for n in range(m, L + 1):                     # 'reduce-1': n >= m
            if abs(m * n) <= rho * L / 2 and abs(m + n) <= L:
                S.append((m, n))
    return S


def init_params(key, M, rho, hdim, Nmodes):
    S = triplet_index(M, rho)
    hf = len(S)
    ks = jax.random.split(key, 5)

    def cinit(k, shape, s):
        kr, ki = jax.random.split(k)
        return ((jax.random.normal(kr, shape) + 1j * jax.random.normal(ki, shape)) * s
                ).astype(jnp.complex64)

    return dict(
        m_idx=jnp.array([m for m, _ in S], dtype=jnp.int32),
        n_idx=jnp.array([n for _, n in S], dtype=jnp.int32),
        scale=jnp.array([2.0 if m != n else 1.0 for m, n in S], dtype=jnp.float32),
        hdim=hdim, hf=hf,
        W1=cinit(ks[0], (hdim, Nmodes, hf), 1.0 / math.sqrt(Nmodes * hf)),
        b1=cinit(ks[1], (hdim,), 0.05),
        W2=cinit(ks[2], (hdim, Nmodes, M), 1.0 / math.sqrt(Nmodes * M)),
        b2=cinit(ks[3], (hdim,), 0.05),
        C=cinit(ks[4], (Nmodes, hf), 0.01),
    )


# ----------------------------------------------------------------------------- pure-JAX reference
def eqsonn_ref(x, task_info, params):
    B, M, Nm = x.shape
    p = M // 2
    hdim = params["hdim"]
    P = 10.0 ** (task_info[:, 0] / 10.0) / Nm
    m_idx, n_idx, scale = params["m_idx"], params["n_idx"], params["scale"]

    Em = jnp.transpose(x[:, p + m_idx, :], (0, 2, 1))
    En = jnp.transpose(x[:, p + n_idx, :], (0, 2, 1))
    Ek = jnp.transpose(x[:, p + m_idx + n_idx, :], (0, 2, 1))
    A0 = En * jnp.conj(Ek)
    fo = (A0 + jnp.roll(A0, 1, axis=1)) * Em * scale[None, None, :]

    pbc = x[:, p, :] + P[:, None] * jnp.sum(params["C"][None] * fo, axis=-1)

    xt = jnp.transpose(x, (0, 2, 1))

    def cconv(inp, W, b):  # ComplexConv1d with kernel_size == length
        return jnp.einsum("bck,ock->bo", inp, W) + b[None]

    A = jnp.stack([cconv(fo, params["W1"], params["b1"]),
                   cconv(fo[:, ::-1, :], params["W1"], params["b1"])], axis=-1)
    Bm = jnp.stack([cconv(xt, params["W2"], params["b2"]),
                    cconv(xt[:, ::-1, :], params["W2"], params["b2"])], axis=-1)
    term = jnp.sum(A * Bm * jnp.conj(Bm) + jnp.conj(A) * Bm * Bm, axis=1)
    return pbc + (1e-4 / math.sqrt(hdim)) * term * (P[:, None] ** 2)


# ----------------------------------------------------------------------------- main
if __name__ == "__main__":
    B, M, Nmodes, rho, hdim = 4, 11, 2, 1.0, 8   # small shapes consistent with the module

    key = jax.random.PRNGKey(0)
    kx, ky, kp = jax.random.split(key, 3)
    params = init_params(kp, M, rho, hdim, Nmodes)

    x = ((jax.random.normal(kx, (B, M, Nmodes))
          + 1j * jax.random.normal(ky, (B, M, Nmodes))) / math.sqrt(2)).astype(jnp.complex64)
    task_info = jnp.stack([jnp.linspace(-1.0, 2.0, B),        # launch power [dBm]
                           jnp.zeros(B),
                           jnp.full((B,), 80.0),
                           jnp.full((B,), 1.0)], axis=-1).astype(jnp.float32)

    out = eqsonn_pallas(x, task_info, params)
    out = jax.block_until_ready(out)

    ref = eqsonn_ref(x, task_info, params)
    np.testing.assert_allclose(np.asarray(out), np.asarray(ref), rtol=2e-2, atol=2e-3)
    print("KERNEL_OK")
</pallas_src>

<mosaic_0001>
module attributes {stable_mosaic.version = 11 : i64} {
  func.func @_eqsonn_kernel(%arg0: i32, %arg1: memref<8x44xf32, #tpu.memory_space<vmem>>, %arg2: memref<8x1xf32, #tpu.memory_space<vmem>>, %arg3: memref<44x216xf32, #tpu.memory_space<vmem>>, %arg4: memref<72x36xbf16, #tpu.memory_space<vmem>>, %arg5: memref<1x36xf32, #tpu.memory_space<vmem>>, %arg6: memref<44x32xbf16, #tpu.memory_space<vmem>>, %arg7: memref<1x32xf32, #tpu.memory_space<vmem>>, %arg8: memref<8x4xf32, #tpu.memory_space<vmem>>) attributes {dimension_semantics = [#tpu.dimension_semantics<parallel>], iteration_bounds = array<i64: 1>, scalar_prefetch = 0 : i64, scratch_operands = 0 : i64, tpu.core_type = #tpu.core_type<tc>, window_params = [{transform_indices = @transform_0, window_bounds = array<i64: 8, 44>}, {transform_indices = @transform_1, window_bounds = array<i64: 8, 1>}, {pipeline_mode = #tpu.pipeline_mode<synchronous>, transform_indices = @transform_2, window_bounds = array<i64: 44, 216>}, {pipeline_mode = #tpu.pipeline_mode<synchronous>, transform_indices = @transform_3, window_bounds = array<i64: 72, 36>}, {pipeline_mode = #tpu.pipeline_mode<synchronous>, transform_indices = @transform_4, window_bounds = array<i64: 1, 36>}, {pipeline_mode = #tpu.pipeline_mode<synchronous>, transform_indices = @transform_5, window_bounds = array<i64: 44, 32>}, {pipeline_mode = #tpu.pipeline_mode<synchronous>, transform_indices = @transform_6, window_bounds = array<i64: 1, 32>}, {transform_indices = @transform_7, window_bounds = array<i64: 8, 4>}]} {
    %c0 = arith.constant 0 : index
    %c0_0 = arith.constant 0 : index
    %0 = vector.load %arg1[%c0, %c0_0] : memref<8x44xf32, #tpu.memory_space<vmem>>, vector<8x44xf32>
    %c0_1 = arith.constant 0 : index
    %c0_2 = arith.constant 0 : index
    %1 = vector.load %arg2[%c0_1, %c0_2] : memref<8x1xf32, #tpu.memory_space<vmem>>, vector<8x1xf32>
    %c0_3 = arith.constant 0 : index
    %c0_4 = arith.constant 0 : index
    %2 = vector.load %arg3[%c0_3, %c0_4] : memref<44x216xf32, #tpu.memory_space<vmem>>, vector<44x216xf32>
    %cst = arith.constant dense<0.000000e+00> : vector<8x216xf32>
    %3 = tpu.matmul %0, %2, %cst {dimension_numbers = #tpu.dot_dimension_numbers<[1], [0], [0], [1], [0, 0, 1, 1], [], []>} : vector<8x44xf32>, vector<44x216xf32>, vector<8x216xf32> -> vector<8x216xf32>
    %4 = vector.extract_strided_slice %3 {offsets = [0, 0], sizes = [8, 72], strides = [1, 1]} : vector<8x216xf32> to vector<8x72xf32>
    %5 = vector.extract_strided_slice %3 {offsets = [0, 72], sizes = [8, 72], strides = [1, 1]} : vector<8x216xf32> to vector<8x72xf32>
    %6 = vector.extract_strided_slice %3 {offsets = [0, 144], sizes = [8, 72], strides = [1, 1]} : vector<8x216xf32> to vector<8x72xf32>
    %7 = vector.extract_strided_slice %5 {offsets = [0, 0], sizes = [8, 36], strides = [1, 1]} : vector<8x72xf32> to vector<8x36xf32>
    %8 = vector.extract_strided_slice %5 {offsets = [0, 36], sizes = [8, 36], strides = [1, 1]} : vector<8x72xf32> to vector<8x36xf32>
    %9 = vector.extract_strided_slice %6 {offsets = [0, 0], sizes = [8, 36], strides = [1, 1]} : vector<8x72xf32> to vector<8x36xf32>
    %10 = vector.extract_strided_slice %6 {offsets = [0, 36], sizes = [8, 36], strides = [1, 1]} : vector<8x72xf32> to vector<8x36xf32>
    %11 = arith.mulf %7, %9 : vector<8x36xf32>
    %12 = arith.mulf %8, %10 : vector<8x36xf32>
    %13 = arith.addf %11, %12 : vector<8x36xf32>
    %14 = arith.mulf %8, %9 : vector<8x36xf32>
    %15 = arith.mulf %7, %10 : vector<8x36xf32>
    %16 = arith.subf %14, %15 : vector<8x36xf32>
    %17 = vector.extract_strided_slice %13 {offsets = [0, 0], sizes = [8, 18], strides = [1, 1]} : vector<8x36xf32> to vector<8x18xf32>
    %18 = vector.extract_strided_slice %13 {offsets = [0, 18], sizes = [8, 18], strides = [1, 1]} : vector<8x36xf32> to vector<8x18xf32>
    %19 = arith.addf %17, %18 : vector<8x18xf32>
    %20 = vector.extract_strided_slice %16 {offsets = [0, 0], sizes = [8, 18], strides = [1, 1]} : vector<8x36xf32> to vector<8x18xf32>
    %21 = vector.extract_strided_slice %16 {offsets = [0, 18], sizes = [8, 18], strides = [1, 1]} : vector<8x36xf32> to vector<8x18xf32>
    %22 = arith.addf %20, %21 : vector<8x18xf32>
    %23 = tpu.concatenate %19, %19 in 1 : vector<8x18xf32>, vector<8x18xf32> -> vector<8x36xf32>
    %24 = tpu.concatenate %22, %22 in 1 : vector<8x18xf32>, vector<8x18xf32> -> vector<8x36xf32>
    %25 = vector.extract_strided_slice %4 {offsets = [0, 0], sizes = [8, 36], strides = [1, 1]} : vector<8x72xf32> to vector<8x36xf32>
    %26 = vector.extract_strided_slice %4 {offsets = [0, 36], sizes = [8, 36], strides = [1, 1]} : vector<8x72xf32> to vector<8x36xf32>
    %27 = arith.mulf %23, %25 : vector<8x36xf32>
    %28 = arith.mulf %24, %26 : vector<8x36xf32>
    %29 = arith.subf %27, %28 : vector<8x36xf32>
    %30 = arith.mulf %23, %26 : vector<8x36xf32>
    %31 = arith.mulf %24, %25 : vector<8x36xf32>
    %32 = arith.addf %30, %31 : vector<8x36xf32>
    %33 = tpu.concatenate %29, %32 in 1 : vector<8x36xf32>, vector<8x36xf32> -> vector<8x72xf32>
    %34 = arith.truncf %33 : vector<8x72xf32> to vector<8x72xbf16>
    %c0_5 = arith.constant 0 : index
    %c0_6 = arith.constant 0 : index
    %35 = vector.load %arg4[%c0_5, %c0_6] : memref<72x36xbf16, #tpu.memory_space<vmem>>, vector<72x36xbf16>
    %cst_7 = arith.constant dense<0.000000e+00> : vector<8x36xf32>
    %36 = tpu.matmul %34, %35, %cst_7 {dimension_numbers = #tpu.dot_dimension_numbers<[1], [0], [0], [1], [0, 0, 1, 1], [], []>} : vector<8x72xbf16>, vector<72x36xbf16>, vector<8x36xf32> -> vector<8x36xf32>
    %c0_8 = arith.constant 0 : index
    %c0_9 = arith.constant 0 : index
    %37 = vector.load %arg5[%c0_8, %c0_9] : memref<1x36xf32, #tpu.memory_space<vmem>>, vector<1x36xf32>
    %38 = vector.broadcast %37 : vector<1x36xf32> to vector<8x36xf32>
    %39 = arith.addf %36, %38 : vector<8x36xf32>
    %40 = arith.truncf %0 : vector<8x44xf32> to vector<8x44xbf16>
    %c0_10 = arith.constant 0 : index
    %c0_11 = arith.constant 0 : index
    %41 = vector.load %arg6[%c0_10, %c0_11] : memref<44x32xbf16, #tpu.memory_space<vmem>>, vector<44x32xbf16>
    %cst_12 = arith.constant dense<0.000000e+00> : vector<8x32xf32>
    %42 = tpu.matmul %40, %41, %cst_12 {dimension_numbers = #tpu.dot_dimension_numbers<[1], [0], [0], [1], [0, 0, 1, 1], [], []>} : vector<8x44xbf16>, vector<44x32xbf16>, vector<8x32xf32> -> vector<8x32xf32>
    %c0_13 = arith.constant 0 : index
    %c0_14 = arith.constant 0 : index
    %43 = vector.load %arg7[%c0_13, %c0_14] : memref<1x32xf32, #tpu.memory_space<vmem>>, vector<1x32xf32>
    %44 = vector.broadcast %43 : vector<1x32xf32> to vector<8x32xf32>
    %45 = arith.addf %42, %44 : vector<8x32xf32>
    %46 = vector.extract_strided_slice %39 {offsets = [0, 0], sizes = [8, 32], strides = [1, 1]} : vector<8x36xf32> to vector<8x32xf32>
    %47 = arith.mulf %46, %45 : vector<8x32xf32>
    %48 = vector.extract_strided_slice %47 {offsets = [0, 0], sizes = [8, 8], strides = [1, 1]} : vector<8x32xf32> to vector<8x8xf32>
    %49 = vector.extract_strided_slice %47 {offsets = [0, 8], sizes = [8, 8], strides = [1, 1]} : vector<8x32xf32> to vector<8x8xf32>
    %50 = arith.addf %48, %49 : vector<8x8xf32>
    %51 = vector.extract_strided_slice %47 {offsets = [0, 16], sizes = [8, 8], strides = [1, 1]} : vector<8x32xf32> to vector<8x8xf32>
    %52 = vector.extract_strided_slice %47 {offsets = [0, 24], sizes = [8, 8], strides = [1, 1]} : vector<8x32xf32> to vector<8x8xf32>
    %53 = arith.addf %51, %52 : vector<8x8xf32>
    %54 = vector.extract_strided_slice %45 {offsets = [0, 0], sizes = [8, 8], strides = [1, 1]} : vector<8x32xf32> to vector<8x8xf32>
    %55 = vector.extract_strided_slice %45 {offsets = [0, 8], sizes = [8, 8], strides = [1, 1]} : vector<8x32xf32> to vector<8x8xf32>
    %56 = vector.extract_strided_slice %45 {offsets = [0, 16], sizes = [8, 8], strides = [1, 1]} : vector<8x32xf32> to vector<8x8xf32>
    %57 = vector.extract_strided_slice %45 {offsets = [0, 24], sizes = [8, 8], strides = [1, 1]} : vector<8x32xf32> to vector<8x8xf32>
    %58 = arith.mulf %50, %54 : vector<8x8xf32>
    %cst_15 = arith.constant dense<0.000000e+00> : vector<8xf32>
    %59 = vector.multi_reduction <add>, %58, %cst_15 [1] : vector<8x8xf32> to vector<8xf32>
    %60 = vector.shape_cast %59 : vector<8xf32> to vector<8x1xf32>
    %61 = arith.mulf %53, %56 : vector<8x8xf32>
    %cst_16 = arith.constant dense<0.000000e+00> : vector<8xf32>
    %62 = vector.multi_reduction <add>, %61, %cst_16 [1] : vector<8x8xf32> to vector<8xf32>
    %63 = vector.shape_cast %62 : vector<8xf32> to vector<8x1xf32>
    %64 = arith.mulf %50, %55 : vector<8x8xf32>
    %cst_17 = arith.constant dense<0.000000e+00> : vector<8xf32>
    %65 = vector.multi_reduction <add>, %64, %cst_17 [1] : vector<8x8xf32> to vector<8xf32>
    %66 = vector.shape_cast %65 : vector<8xf32> to vector<8x1xf32>
    %67 = arith.mulf %53, %57 : vector<8x8xf32>
    %cst_18 = arith.constant dense<0.000000e+00> : vector<8xf32>
    %68 = vector.multi_reduction <add>, %67, %cst_18 [1] : vector<8x8xf32> to vector<8xf32>
    %69 = vector.shape_cast %68 : vector<8xf32> to vector<8x1xf32>
    %70 = tpu.concatenate %60, %63, %66, %69 in 1 : vector<8x1xf32>, vector<8x1xf32>, vector<8x1xf32>, vector<8x1xf32> -> vector<8x4xf32>
    %cst_19 = arith.constant 2.000000e+00 : f32
    %71 = vector.broadcast %cst_19 : f32 to vector<8x4xf32>
    %72 = arith.mulf %70, %71 : vector<8x4xf32>
    %73 = vector.extract_strided_slice %0 {offsets = [0, 5], sizes = [8, 1], strides = [1, 1]} : vector<8x44xf32> to vector<8x1xf32>
    %74 = vector.extract_strided_slice %0 {offsets = [0, 16], sizes = [8, 1], strides = [1, 1]} : vector<8x44xf32> to vector<8x1xf32>
    %75 = vector.extract_strided_slice %0 {offsets = [0, 27], sizes = [8, 1], strides = [1, 1]} : vector<8x44xf32> to vector<8x1xf32>
    %76 = vector.extract_strided_slice %0 {offsets = [0, 38], sizes = [8, 1], strides = [1, 1]} : vector<8x44xf32> to vector<8x1xf32>
    %77 = tpu.concatenate %73, %74, %75, %76 in 1 : vector<8x1xf32>, vector<8x1xf32>, vector<8x1xf32>, vector<8x1xf32> -> vector<8x4xf32>
    %78 = vector.extract_strided_slice %39 {offsets = [0, 32], sizes = [8, 4], strides = [1, 1]} : vector<8x36xf32> to vector<8x4xf32>
    %79 = vector.broadcast %1 : vector<8x1xf32> to vector<8x4xf32>
    %80 = arith.mulf %79, %78 : vector<8x4xf32>
    %81 = arith.addf %77, %80 : vector<8x4xf32>
    %82 = arith.mulf %1, %1 : vector<8x1xf32>
    %cst_20 = arith.constant 3.53553405E-5 : f32
    %83 = vector.broadcast %cst_20 : f32 to vector<8x1xf32>
    %84 = arith.mulf %83, %82 : vector<8x1xf32>
    %85 = vector.broadcast %84 : vector<8x1xf32> to vector<8x4xf32>
    %86 = arith.mulf %85, %72 : vector<8x4xf32>
    %87 = arith.addf %81, %86 : vector<8x4xf32>
    %c0_21 = arith.constant 0 : index
    %c0_22 = arith.constant 0 : index
    %88 = vector.load %arg8[%c0_21, %c0_22] : memref<8x4xf32, #tpu.memory_space<vmem>>, vector<8x4xf32>
    tpu.vector_store %arg8[%c0_21, %c0_22], %87 {strides = array<i32>} : memref<8x4xf32, #tpu.memory_space<vmem>>, vector<8x4xf32>,
    return
  }
  func.func @transform_0(%arg0: i32) -> (i32, i32) {
    %c0_i32 = arith.constant 0 : i32
    %c0_i32_0 = arith.constant 0 : i32
    return %arg0, %c0_i32 : i32, i32
  }
  func.func @transform_1(%arg0: i32) -> (i32, i32) {
    %c0_i32 = arith.constant 0 : i32
    %c0_i32_0 = arith.constant 0 : i32
    return %arg0, %c0_i32 : i32, i32
  }
  func.func @transform_2(%arg0: i32) -> (i32, i32) {
    %c0_i32 = arith.constant 0 : i32
    %c0_i32_0 = arith.constant 0 : i32
    %c0_i32_1 = arith.constant 0 : i32
    return %c0_i32, %c0_i32_0 : i32, i32
  }
  func.func @transform_3(%arg0: i32) -> (i32, i32) {
    %c0_i32 = arith.constant 0 : i32
    %c0_i32_0 = arith.constant 0 : i32
    %c0_i32_1 = arith.constant 0 : i32
    return %c0_i32, %c0_i32_0 : i32, i32
  }
  func.func @transform_4(%arg0: i32) -> (i32, i32) {
    %c0_i32 = arith.constant 0 : i32
    %c0_i32_0 = arith.constant 0 : i32
    %c0_i32_1 = arith.constant 0 : i32
    return %c0_i32, %c0_i32_0 : i32, i32
  }
  func.func @transform_5(%arg0: i32) -> (i32, i32) {
    %c0_i32 = arith.constant 0 : i32
    %c0_i32_0 = arith.constant 0 : i32
    %c0_i32_1 = arith.constant 0 : i32
    return %c0_i32, %c0_i32_0 : i32, i32
  }
  func.func @transform_6(%arg0: i32) -> (i32, i32) {
    %c0_i32 = arith.constant 0 : i32
    %c0_i32_0 = arith.constant 0 : i32
    %c0_i32_1 = arith.constant 0 : i32
    return %c0_i32, %c0_i32_0 : i32, i32
  }
  func.func @transform_7(%arg0: i32) -> (i32, i32) {
    %c0_i32 = arith.constant 0 : i32
    %c0_i32_0 = arith.constant 0 : i32
    return %arg0, %c0_i32 : i32, i32
  }
}

</mosaic_0001>

<bundles_post_ra>
// kernel: tpu_custom_call.1
= control target key start
LH: loop header
LB: loop body
LE: loop exit
PB: predicated region body
PF: predicated region fallthrough
CT: control target
= control target key end

     0   :  { %vm45_vm0 = vcmask 1043456   ;;  %vm41_vm1 = vcmask 359424   ;;  %s421_s27 = smov 92   ;;  %s423_s28 = smov 20   ;;  %vm104_vm2 = vcmask 752640   ;;  %vm134_vm3 = vcmask 900096   ;;  %s592_s2 = inlined_call_operand.vmem [shape: f32[44,216], index: 2, kind: input, shape index: {}]   ;;  %s593_s0 = inlined_call_operand.vmem [shape: f32[8,44], index: 0, kind: input, shape index: {}]   ;;  %s594_s3 = inlined_call_operand.vmem [shape: bf16[72,36], index: 3, kind: input, shape index: {}]   ;;  %s595_s5 = inlined_call_operand.vmem [shape: bf16[44,32], index: 5, kind: input, shape index: {}]   ;;  %s596_s6 = inlined_call_operand.vmem [shape: f32[1,32], index: 6, kind: input, shape index: {}]   ;;  %s597_s4 = inlined_call_operand.vmem [shape: f32[1,36], index: 4, kind: input, shape index: {}]   ;;  %s598_s1 = inlined_call_operand.vmem [shape: f32[8,1], index: 1, kind: input, shape index: {}]   ;;  %s599_s7 = inlined_call_operand.vmem [shape: f32[8,4], index: 7, kind: output, shape index: {}]  }
   0x1   :  { %v40_v0 = vld [vmem:[%s592_s2 + $0x58] sm:$0xf]  ;;  %v38_v1 = vld [vmem:[%s592_s2 + $0x48] sm:$0xff]  ;;  %v39_v3 = vld [vmem:[%s592_s2 + $0x50] sm:$0xf]  ;;  %s425_s29 = smov 110  }
   0x2   :  { %363 = vmatpush.msk.msra.mxu1 %vm45_vm0, %v40_v0  ;;  %v36_v2 = vld [vmem:[%s592_s2 + $0x38] sm:$0xff]  ;;  %v37_v4 = vld [vmem:[%s592_s2 + $0x40] sm:$0xff]  ;;  %361 = vmatpush.msk.msra.mxu0 %vm45_vm0, %v39_v3  ;;  %v34_v5 = vld [vmem:[%s592_s2 + $0x28] sm:$0xff]  ;;  %s426_s30 = smov 74   ;;  %s427_s8 = smov 38   ;;  %vm263_vm4 = vcmask 1045504  }
   0x3   :  { %v35_v6 = vld [vmem:[%s592_s2 + $0x30] sm:$0xff]  ;;  %v32_v7 = vld [vmem:[%s592_s2 + $0x18] sm:$0xff]  ;;  %v33_v8 = vld [vmem:[%s592_s2 + $0x20] sm:$0xff]  ;;  %vm145_vm5 = vcmask 146432   ;;  %vm169_vm6 = vcmask 293888   ;;  %vm212_vm7 = vcmask 588800  }
   0x4   :  { %83 = vmatpush.msra.mxu1 %v38_v1  ;;  %63 = vmatpush.msra.mxu0 %v37_v4  ;;  %v30_v9 = vld [vmem:[%s592_s2 + $0x8] sm:$0xff]  ;;  %v31_v10 = vld [vmem:[%s592_s2 + $0x10] sm:$0xff]  ;;  %v514_v11 = vld [vmem:[%s593_s0] sm:$0xff]  ;;  %s422_s0 = smov 56   ;;  %vm287_vm8 = vcmask 64512   ;;  %s433_s9 = smov 112  }
   0x5   :  { %v29_v12 = vld [vmem:[%s592_s2] sm:$0xff]  ;;  %s424_s2 = smov 36   ;;  %v392_v37 = vld [vmem:[%s595_s5 + $0x10] sm:$0xf]  ;;  %v401_v38 = vld [vmem:[%s595_s5 + $0x10] sm:$0x30]  ;;  %v232_v48 = vpack.c.bf16 %v514_v11, %v514_v11 }
   0x6   :  { %84 = vmatpush.msra.mxu1 %v36_v2  ;;  %64 = vmatpush.msra.mxu0 %v35_v6  ;;  %v180_v36 = vld [vmem:[%s594_s3 + $0x20] sm:$0xf]  ;;  %v393_v40 = vor.u32 %v401_v38, %v392_v37  ;;  %v400_v43 = vld [vmem:[%s595_s5 + $0x8] sm:$0xff]  ;;  %v398_v45 = vld [vmem:[%s594_s3 + $0x18] sm:$0xff]  ;;  %vm313_vm9 = vcmask 7168   ;;  %vm315_vm10 = vcmask 15360  }
   0x7   :  { %v202_v39 = vunpack.c.l.b16 %v180_v36  ;;  %v399_v46 = vld [vmem:[%s595_s5] sm:$0xff]  ;;  %v397_v47 = vld [vmem:[%s594_s3 + $0x10] sm:$0xff]  ;;  %v396_v49 = vld [vmem:[%s594_s3 + $0x8] sm:$0xff]  ;;  %vm317_vm11 = vcmask 23552   ;;  %vm355_vm12 = vcmask 31744  }
   0x8   :  { %85 = vmatpush.msra.mxu1 %v34_v5  ;;  %65 = vmatpush.msra.mxu0 %v33_v8  ;;  %v265_v42 = vsel %vm263_vm4, %v393_v40, 0  ;;  %v395_v63 = vld [vmem:[%s594_s3] sm:$0xff]  ;;  %s431_s3 = smov 113  }
   0x9   :  { %v207_v41 = vpack.c.b16 %v202_v39, %v202_v39  ;;  %272 = vmatpush.bf16.msra.mxu3 %v265_v42  ;;  %v419_v3 = vld [vmem:[%s596_s6] ss:$0 sm:$0xff] }
   0xa   :  { %86 = vmatpush.msra.mxu1 %v32_v7  ;;  %66 = vmatpush.msra.mxu0 %v31_v10  ;;  %v432_v7 = vmov 0   ;;  %v420_v8 = vld [vmem:[%s597_s4] ss:$0 sm:$0xff]  ;;  %s434_s4 = smov 93  }
   0xb   :  { %v217_v44 = vsel %vm45_vm0, %v207_v41, 0  ;;  %417 = vset.pattern.permute.xlu0 %v432_v7  ;;  %418 = vset.pattern.permute.xlu1 %v432_v7 }
   0xc   :  { %87 = vmatpush.msra.mxu1 %v30_v9  ;;  %67 = vmatpush.msra.mxu0 %v29_v12 }
   0xd   :  { %364 = vmatmul.msk.f32.vlgmr.msra.gmra.mxu1 %vm41_vm1, %v514_v11  ;;  %362 = vmatmul.msk.f32.vlgmr.msra.gmra.mxu0 %vm41_vm1, %v514_v11 }
   0xe   :  { %222 = vmatpush.bf16.msra.mxu2 %v217_v44  ;;  %273 = vmatpush.bf16.msra.mxu3 %v400_v43 }
  0x12   :  { %223 = vmatpush.bf16.msra.mxu2 %v398_v45  ;;  %274 = vmatpush.bf16.msra.mxu3 %v399_v46 }
  0x15   :  { %394 = vmatmul.msk.bf16.vlgmr.msra.gmra.mxu3 %vm41_vm1, %v232_v48 }
  0x16   :  { %224 = vmatpush.bf16.msra.mxu2 %v397_v47 }
  0x1a   :  { %225 = vmatpush.bf16.msra.mxu2 %v396_v49 }
  0x1e   :  { %226 = vmatpush.bf16.msra.mxu2 %v395_v63 }
  0x8a   :  { %v89_v13 = vpop.f32.mrf.mxu1  ;;  %v526_v14 = vpop.f32.mrf.mxu0 }
  0x8b   :  { %108 = vrot.lane.b32.xlu1 %v89_v13, %s421_s27  ;;  %93 = vrot.lane.b32.xlu0 %v89_v13, %s422_s0 }
  0x93   :  { %113 = vrot.lane.b32.xlu0 %v89_v13, %s423_s28 }
  0x98   :  { %v276_v4 = vpop.f32.mrf.mxu3 }
  0x99   :  { %v277_v5 = vadd.f32 %v419_v3, %v276_v4 }
  0xa0   :  { %v278_v6 = vpop.f32.mrf.mxu3 }
  0xfd   :  { %v94_v15 = vpop.permute.xlu0 %93  ;;  %v109_v21 = vpop.permute.xlu1 %108 }
  0xfe   :  { %v97_v16 = vmul.f32 %v94_v15, %v89_v13  ;;  %v96_v17 = vmul.f32 %v94_v15, %v526_v14  ;;  %v112_v22 = vmul.f32 %v109_v21, %v89_v13  ;;  %v111_v23 = vmul.f32 %v109_v21, %v526_v14 }
 0x100   :  { %102 = vrot.lane.b32.xlu2 %v97_v16, %s421_s27  ;;  %100 = vrot.lane.b32.xlu1 %v96_v17, %s421_s27 }
 0x105   :  { %v114_v18 = vpop.permute.xlu0 %113 }
 0x106   :  { %v116_v19 = vmul.f32 %v114_v18, %v526_v14 }
 0x108   :  { %118 = vrot.lane.b32.xlu2 %v116_v19, %s424_s2 }
 0x15a   :  { %v103_v20 = vpop.permute.xlu2 %102 }
 0x162   :  { %v119_v24 = vpop.permute.xlu2 %118 }
 0x163   :  { %v121_v25 = vsub.f32 %v111_v23, %v119_v24  ;;  %v122_v26 = vsub.f32 %v112_v22, %v119_v24 }
 0x165   :  { %130 = vrot.lane.b32.xlu0 %v121_v25, %s425_s29  ;;  %132 = vrot.lane.b32.xlu1 %v122_v26, %s425_s29 }
 0x172   :  { %v101_v27 = vpop.permute.xlu1 %100 }
 0x173   :  { %v105_v28 = vsel %vm104_vm2, %v101_v27, %v103_v20 }
 0x174   :  { %v107_v29 = vadd.f32 %v105_v28, %v96_v17 }
 0x176   :  { %124 = vrot.lane.b32.xlu2 %v107_v29, %s425_s29 }
 0x1d0   :  { %v125_v30 = vpop.permute.xlu2 %124 }
 0x1d1   :  { %v127_v31 = vadd.f32 %v125_v30, %v107_v29 }
 0x1d3   :  { %142 = vrot.lane.b32.xlu1 %v127_v31, %s426_s30  ;;  %139 = vrot.lane.b32.xlu0 %v127_v31, %s422_s0  ;;  %s428_s0 = smov 123  }
 0x1d7   :  { %v131_v32 = vpop.permute.xlu0 %130  ;;  %v133_v33 = vpop.permute.xlu1 %132 }
 0x1d8   :  { %v135_v34 = vsel %vm134_vm3, %v131_v32, %v133_v33 }
 0x1d9   :  { %v137_v35 = vadd.f32 %v135_v34, %v121_v25 }
 0x1db   :  { %157 = vrot.lane.b32.xlu1 %v526_v14, %s421_s27  ;;  %151 = vrot.lane.b32.xlu0 %v137_v35, %s427_s8 }
 0x1dc   :  { %148 = vrot.lane.b32.xlu2 %v137_v35, %s423_s28  ;;  %s429_s28 = smov 120  }
 0x1e3   :  { %299 = vrot.lane.b32.xlu1 %v277_v5, %s429_s28 }
 0x1eb   :  { %323 = vrot.lane.b32.xlu1 %v514_v11, %s431_s3 }
 0x236   :  { %v149_v52 = vpop.permute.xlu2 %148 }
 0x245   :  { %v140_v50 = vpop.permute.xlu0 %139  ;;  %v143_v51 = vpop.permute.xlu1 %142 }
 0x246   :  { %v146_v53 = vsel %vm145_vm5, %v140_v50, %v143_v51 }
 0x247   :  { %v155_v58 = vmul.f32 %v146_v53, %v526_v14 }
 0x24d   :  { %v152_v54 = vpop.permute.xlu0 %151  ;;  %v158_v55 = vpop.permute.xlu1 %157 }
 0x24e   :  { %v154_v56 = vsel %vm145_vm5, %v149_v52, %v152_v54  ;;  %v162_v57 = vmul.f32 %v158_v55, %v146_v53 }
 0x24f   :  { %v163_v59 = vmul.f32 %v154_v56, %v526_v14  ;;  %v160_v60 = vmul.f32 %v158_v55, %v154_v56  ;;  %v28_v14 = vld [vmem:[%s598_s1] sm:$0xff]  ;;  %s435_s1 = smov 96  }
 0x250   :  { %v346_v28 = vmul.f32 %v28_v14, %v28_v14 }
 0x251   :  { %v161_v61 = vsub.f32 %v155_v58, %v160_v60  ;;  %v164_v62 = vadd.f32 %v163_v59, %v162_v57 }
 0x252   :  { %v347_v29 = vmul.f32 3.535534e-05, %v346_v28 }
 0x253   :  { %166 = vrot.lane.b32.xlu2 %v164_v62, %s424_s2  ;;  %s430_s2 = smov 103  }
 0x255   :  { %v300_v17 = vpop.permute.xlu1 %299 }
 0x25b   :  { %320 = vrot.lane.b32.xlu2 %v514_v11, %s428_s0 }
 0x25d   :  { %v324_v22 = vpop.permute.xlu1 %323 }
 0x263   :  { %326 = vrot.lane.b32.xlu2 %v514_v11, %s430_s2 }
 0x2ad   :  { %v167_v0 = vpop.permute.xlu2 %166 }
 0x2ae   :  { %v170_v1 = vsel %vm169_vm6, %v161_v61, %v167_v0 }
 0x2af   :  { %v171_v2 = vpack.c.bf16 %v170_v1, %v170_v1 }
 0x2b1   :  { %381 = vmatmul.msk.bf16.vlgmr.msra.gmra.mxu2 %vm212_vm7, %v171_v2 }
 0x2b5   :  { %v321_v31 = vpop.permute.xlu2 %320 }
 0x2b6   :  { %v332_v38 = vsel %vm313_vm9, %v321_v31, %v324_v22 }
 0x2bd   :  { %v327_v32 = vpop.permute.xlu2 %326 }
 0x2be   :  { %v333_v42 = vsel %vm315_vm10, %v332_v38, %v327_v32 }
 0x334   :  { %v228_v9 = vpop.f32.mrf.mxu2 }
 0x335   :  { %v229_v10 = vadd.f32 %v420_v8, %v228_v9 }
 0x337   :  { %v280_v12 = vmul.f32 %v277_v5, %v229_v10 }
 0x339   :  { %282 = vrot.lane.b32.xlu0 %v280_v12, %s429_s28 }
 0x33c   :  { %v230_v13 = vpop.f32.mrf.mxu2 }
 0x341   :  { %337 = vperm.xlu0 %417, %v28_v14  }
 0x3ab   :  { %v283_v15 = vpop.permute.xlu0 %282 }
 0x3ac   :  { %v285_v16 = vadd.f32 %v283_v15, %v280_v12 }
 0x3ae   :  { %v286_v18 = vmul.f32 %v285_v16, %v277_v5  ;;  %v302_v19 = vmul.f32 %v300_v17, %v285_v16 }
 0x3b0   :  { %292 = vrot.lane.b32.xlu0 %v286_v18, %s433_s9  ;;  %307 = vrot.lane.b32.xlu1 %v302_v19, %s433_s9  ;;  %v288_v20 = vsel %vm287_vm8, %v286_v18, 0.0  ;;  %v303_v21 = vsel %vm287_vm8, %v302_v19, 0.0 }
 0x3b1   :  { %289 = vadd.xlane.f32.xlu2 %v288_v20 }
 0x3b3   :  { %v338_v23 = vpop.permute.xlu0 %337 }
 0x3b4   :  { %v340_v30 = vmul.f32 %v338_v23, %v229_v10 }
 0x3da   :  { %304 = vadd.xlane.f32.xlu0 %v303_v21 }
 0x3ee   :  { %329 = vrot.lane.b32.xlu0 %v514_v11, %s434_s4 }
 0x422   :  { %v293_v24 = vpop.permute.xlu0 %292  ;;  %v308_v25 = vpop.permute.xlu1 %307 }
 0x423   :  { %v295_v26 = vsel %vm287_vm8, %v293_v24, 0.0  ;;  %v310_v27 = vsel %vm287_vm8, %v308_v25, 0.0 }
 0x424   :  { %296 = vadd.xlane.f32.xlu1 %v295_v26  ;;  %311 = vadd.xlane.f32.xlu2 %v310_v27  ;;  %v290_v33 = vpop.xlane.xlu2 %289 }
 0x43c   :  { %342 = vrot.lane.b32.xlu2 %v340_v30, %s435_s1 }
 0x43d   :  { %350 = vperm.xlu1 %418, %v347_v29  }
 0x44d   :  { %v305_v35 = vpop.xlane.xlu0 %304 }
 0x460   :  { %v330_v40 = vpop.permute.xlu0 %329 }
 0x461   :  { %v334_v44 = vsel %vm317_vm11, %v333_v42, %v330_v40 }
 0x497   :  { %v297_v11 = vpop.xlane.xlu1 %296  ;;  %v312_v34 = vpop.xlane.xlu2 %311 }
 0x498   :  { %v314_v36 = vsel %vm313_vm9, %v290_v33, %v297_v11 }
 0x499   :  { %v316_v37 = vsel %vm315_vm10, %v314_v36, %v305_v35 }
 0x49a   :  { %v318_v39 = vsel %vm317_vm11, %v316_v37, %v312_v34 }
 0x49b   :  { %v319_v43 = vmul.f32 2.0, %v318_v39 }
 0x49f   :  { %v343_v41 = vpop.permute.xlu2 %342 }
 0x4a0   :  { %v345_v46 = vadd.f32 %v343_v41, %v334_v44 }
 0x4af   :  { %v351_v45 = vpop.permute.xlu1 %350 }
 0x4b0   :  { %v353_v47 = vmul.f32 %v351_v45, %v319_v43 }
 0x4b2   :  { %v354_v48 = vadd.f32 %v353_v47, %v345_v46 }
 0x4b4   :  { %356 = vst.msk [vmem:[%s599_s7] sm:$0xff] %vm355_vm12, %v354_v48 }

</bundles_post_ra>
